<compile_context>
chip_gen: v7x
topology: tpu7x:2x2x1
jax: 0.10.0
libtpu: 0.0.40
codegen_flags: <defaults>
</compile_context>

<pallas_src>
import jax
import jax.numpy as jnp
from jax import lax
from jax.experimental import pallas as pl
from jax.experimental.pallas import tpu as pltpu


def _round_up(v, m):
    return (v + m - 1) // m * m


def _vmem_capacity_bytes(default=64 * 1024 * 1024):
    """Physical VMEM of the current chip (falls back to the v7x-safe 64 MiB)."""
    try:
        info = pltpu.get_tpu_info()
        cap = getattr(info, "vmem_capacity_bytes", None)
        if cap:
            return int(cap)
    except Exception:
        pass
    return default


def _block_footprint_bytes(cin, tb, to, tm):
    """Double-buffered VMEM footprint of one grid step ((8,128)-tile padded)."""
    tb_p = _round_up(tb, 8)
    to_p = _round_up(to, 8)
    tm_p = _round_up(tm, 128)
    x_b = cin * 2 * tb_p * tm_p * 4          # (Cin, 2, TB, TM) f32
    w_b = cin * 2 * to_p * tm_p * 4          # (Cin, 2, TO, TM) f32
    o_b = 2 * tb_p * to_p * tm_p * 4         # (2, TB, TO, TM)  f32
    return 2 * (x_b + w_b + o_b)             # x2: double-buffered pipeline


def _choose_tiles(b, cin, cout, m, budget_bytes):
    """Pick (TB, TO, TM) block sizes that fit `budget_bytes` of VMEM.

    Preference: full Cout (then x and the weights are each read from HBM
    exactly once) and the largest lane tile; shrink TO only if needed.
    All candidates respect the (8, 128) / full-extent block rules.
    """
    tb = b if (b <= 8 or b % 8 != 0) else 8
    tm_cands = [m] if m <= 512 else [512, 384, 256, 128]
    to_cands = [cout] + [c for c in (32, 16, 8) if c < cout]
    for to in to_cands:
        for tm in tm_cands:
            if _block_footprint_bytes(cin, tb, to, tm) <= budget_bytes:
                return tb, to, tm
    raise ValueError(
        "SpectralConv2d Pallas kernel: even the smallest tile "
        f"(TB={tb}, TO={to_cands[-1]}, TM={tm_cands[-1]}) exceeds the VMEM "
        f"budget of {budget_bytes} bytes; reduce channels/batch or tile Cin.")


def _spectral_mul_kernel(x_ref, w_ref, o_ref):
    """Complex channel mixing: out[b, o, m] = sum_i x[b, i, m] * w[i, o, m].

    Block shapes (retained modes on the lane axis, real/imag packed):
      x_ref: (Cin, 2, TB, TM)   w_ref: (Cin, 2, TO, TM)   o_ref: (2, TB, TO, TM)
    """
    cin = x_ref.shape[0]
    tb = x_ref.shape[2]
    tm = x_ref.shape[3]
    to = w_ref.shape[2]

    # Per-accumulator chunk: at most (TB<=8, 8, 128) f32 x2 (~16 vregs), so
    # the Cin loop never spills no matter how big the DMA block is.
    oc = 8 if to % 8 == 0 else to
    mc = 128 if tm % 128 == 0 else tm
    unroll = max(u for u in (1, 2, 4) if cin % u == 0)

    for o0 in range(0, to, oc):            # static chunk loops: slices are free
        for m0 in range(0, tm, mc):

            def body(i, carry, o0=o0, m0=m0):
                acc_r, acc_i = carry
                # Load each slab right before use (bounded live ranges).
                xr = x_ref[i, 0, :, m0:m0 + mc]               # (TB, MC)
                xi = x_ref[i, 1, :, m0:m0 + mc]
                wr = w_ref[i, 0, o0:o0 + oc, m0:m0 + mc]      # (OC, MC)
                wi = w_ref[i, 1, o0:o0 + oc, m0:m0 + mc]
                # Gauss 3-multiplication complex MAC:
                #   re += (xr+xi)*wr - xi*(wr+wi)
                #   im += (xr+xi)*wr + xr*(wi-wr)
                ws = (wr + wi)[None, :, :]                    # amortised over TB
                wd = (wi - wr)[None, :, :]
                k1 = (xr + xi)[:, None, :] * wr[None, :, :]
                acc_r = acc_r + (k1 - xi[:, None, :] * ws)
                acc_i = acc_i + (k1 + xr[:, None, :] * wd)
                return acc_r, acc_i

            zero = jnp.zeros((tb, oc, mc), jnp.float32)
            acc_r, acc_i = lax.fori_loop(0, cin, body, (zero, zero),
                                         unroll=unroll)
            o_ref[0, :, o0:o0 + oc, m0:m0 + mc] = acc_r
            o_ref[1, :, o0:o0 + oc, m0:m0 + mc] = acc_i


def _spectral_mul_pallas(xp, wp):
    """xp: (Cin, 2, B, M) f32; wp: (Cin, 2, Cout, M) f32 -> (2, B, Cout, M)."""
    cin, _, b, m = xp.shape
    cout = wp.shape[2]

    cap = _vmem_capacity_bytes()
    tb, to, tm = _choose_tiles(b, cin, cout, m, budget_bytes=int(0.6 * cap))
    footprint = _block_footprint_bytes(cin, tb, to, tm)
    # Limit derived from the real footprint + headroom; never the full chip.
    vmem_limit = int(min(0.9 * cap,
                         max(32 * 1024 * 1024, footprint + 16 * 1024 * 1024)))

    grid = (pl.cdiv(m, tm), pl.cdiv(cout, to), pl.cdiv(b, tb))

    x_spec = pl.BlockSpec((cin, 2, tb, tm), lambda mi, oi, bi: (0, 0, bi, mi))
    # Weight index_map ignores the innermost batch axis -> the weight block is
    # fetched once per (mode, Cout) tile and reused across all batch steps.
    w_spec = pl.BlockSpec((cin, 2, to, tm), lambda mi, oi, bi: (0, 0, oi, mi))
    o_spec = pl.BlockSpec((2, tb, to, tm), lambda mi, oi, bi: (0, bi, oi, mi))

    return pl.pallas_call(
        _spectral_mul_kernel,
        out_shape=jax.ShapeDtypeStruct((2, b, cout, m), jnp.float32),
        grid_spec=pltpu.PrefetchScalarGridSpec(
            num_scalar_prefetch=0,
            grid=grid,
            in_specs=[x_spec, w_spec],
            out_specs=o_spec),
        compiler_params=pltpu.CompilerParams(
            dimension_semantics=("parallel", "parallel", "parallel"),
            vmem_limit_bytes=vmem_limit),
    )(xp, wp)


def spectral_conv2d(x, weights1, weights2, modes1, modes2):
    """Forward pass of SpectralConv2d.

    x: (B, Cin, H, W) float32 (NCHW, like PyTorch)
    weights1, weights2: (Cin, Cout, modes1, modes2) complex64
    returns: (B, Cout, H, W) float32
    """
    B, Cin, H, W = x.shape
    Cout = weights1.shape[1]
    Wh = W // 2 + 1
    M = 2 * modes1 * modes2

    # TODO(synk): rfft2/irfft2 have no Pallas equivalent; they run in XLA.
    x_ft = jnp.fft.rfft2(x)                                   # (B, Cin, H, Wh)

    top = x_ft[:, :, :modes1, :modes2]                        # (B, Cin, m1, m2)
    bot = x_ft[:, :, -modes1:, :modes2]

    # Flatten the two spectral corners onto the LAST (lane) axis, put the Cin
    # contraction index on the leading axis, and pack real/imag on axis 1.
    xc = jnp.stack([top, bot], axis=2).reshape(B, Cin, M)     # complex (B,Cin,M)
    xp = jnp.transpose(
        jnp.stack([jnp.real(xc), jnp.imag(xc)], axis=0),      # (2, B, Cin, M)
        (2, 0, 1, 3)).astype(jnp.float32)                     # (Cin, 2, B, M)

    wc = jnp.stack([weights1, weights2], axis=2).reshape(Cin, Cout, M)
    wp = jnp.stack([jnp.real(wc), jnp.imag(wc)],
                   axis=1).astype(jnp.float32)                # (Cin, 2, Cout, M)

    out = _spectral_mul_pallas(xp, wp)                        # (2, B, Cout, M)

    out_c = (out[0] + 1j * out[1]).astype(jnp.complex64)
    out_c = out_c.reshape(B, Cout, 2, modes1, modes2)

    # Scatter the two corners back into the zero spectrum (PyTorch order).
    out_ft = jnp.zeros((B, Cout, H, Wh), dtype=jnp.complex64)
    out_ft = out_ft.at[:, :, :modes1, :modes2].set(out_c[:, :, 0])
    out_ft = out_ft.at[:, :, H - modes1:, :modes2].set(out_c[:, :, 1])

    return jnp.fft.irfft2(out_ft, s=(H, W))


def _reference(x, weights1, weights2, modes1, modes2):
    """Pure-JAX reference (mirrors the PyTorch forward exactly)."""
    B, Cin, H, W = x.shape
    Cout = weights1.shape[1]
    x_ft = jnp.fft.rfft2(x)
    out_ft = jnp.zeros((B, Cout, H, W // 2 + 1), dtype=jnp.complex64)
    out_ft = out_ft.at[:, :, :modes1, :modes2].set(
        jnp.einsum('bixy,ioxy->boxy', x_ft[:, :, :modes1, :modes2], weights1))
    out_ft = out_ft.at[:, :, H - modes1:, :modes2].set(
        jnp.einsum('bixy,ioxy->boxy', x_ft[:, :, -modes1:, :modes2], weights2))
    return jnp.fft.irfft2(out_ft, s=(H, W))


if __name__ == "__main__":
    B, Cin, Cout = 2, 4, 4
    H = W = 16
    modes1 = modes2 = 4

    key = jax.random.PRNGKey(0)
    kx, k1r, k1i, k2r, k2i = jax.random.split(key, 5)

    x = jax.random.normal(kx, (B, Cin, H, W), dtype=jnp.float32)

    # Deterministic parameter init, matching torch.rand(...) * scale semantics
    # (uniform [0,1) real and imaginary parts, scaled by 1/(Cin*Cout)).
    scale = 1.0 / (Cin * Cout)
    w1 = (scale * jax.random.uniform(k1r, (Cin, Cout, modes1, modes2))
          + 1j * scale * jax.random.uniform(k1i, (Cin, Cout, modes1, modes2))
          ).astype(jnp.complex64)
    w2 = (scale * jax.random.uniform(k2r, (Cin, Cout, modes1, modes2))
          + 1j * scale * jax.random.uniform(k2i, (Cin, Cout, modes1, modes2))
          ).astype(jnp.complex64)

    out = spectral_conv2d(x, w1, w2, modes1, modes2)
    out = jax.block_until_ready(out)

    ref = jax.block_until_ready(_reference(x, w1, w2, modes1, modes2))
    assert out.shape == (B, Cout, H, W)
    assert jnp.allclose(out, ref, atol=1e-5, rtol=1e-5)

    print("KERNEL_OK")
</pallas_src>

<mosaic_0001>
module attributes {stable_mosaic.version = 11 : i64} {
  func.func @_spectral_mul_kernel(%arg0: i32, %arg1: i32, %arg2: i32, %arg3: memref<4x2x2x32xf32, #tpu.memory_space<vmem>>, %arg4: memref<4x2x4x32xf32, #tpu.memory_space<vmem>>, %arg5: memref<2x2x4x32xf32, #tpu.memory_space<vmem>>) attributes {dimension_semantics = [#tpu.dimension_semantics<parallel>, #tpu.dimension_semantics<parallel>, #tpu.dimension_semantics<parallel>], iteration_bounds = array<i64: 1, 1, 1>, scalar_prefetch = 0 : i64, scratch_operands = 0 : i64, tpu.core_type = #tpu.core_type<tc>, window_params = [{transform_indices = @transform_0, window_bounds = array<i64: 4, 2, 2, 32>}, {transform_indices = @transform_1, window_bounds = array<i64: 4, 2, 4, 32>}, {transform_indices = @transform_2, window_bounds = array<i64: 2, 2, 4, 32>}]} {
    %cst = arith.constant 0.000000e+00 : f32
    %0 = vector.broadcast %cst : f32 to vector<2x4x32xf32>
    %c0_i32 = arith.constant 0 : i32
    %1 = arith.index_cast %c0_i32 : i32 to index
    %c0 = arith.constant 0 : index
    %c0_0 = arith.constant 0 : index
    %c0_1 = arith.constant 0 : index
    %2 = vector.load %arg3[%1, %c0, %c0_0, %c0_1] : memref<4x2x2x32xf32, #tpu.memory_space<vmem>>, vector<1x1x2x32xf32>
    %3 = vector.shape_cast %2 : vector<1x1x2x32xf32> to vector<2x32xf32>
    %4 = arith.index_cast %c0_i32 : i32 to index
    %c1 = arith.constant 1 : index
    %c0_2 = arith.constant 0 : index
    %c0_3 = arith.constant 0 : index
    %5 = vector.load %arg3[%4, %c1, %c0_2, %c0_3] : memref<4x2x2x32xf32, #tpu.memory_space<vmem>>, vector<1x1x2x32xf32>
    %6 = vector.shape_cast %5 : vector<1x1x2x32xf32> to vector<2x32xf32>
    %7 = arith.index_cast %c0_i32 : i32 to index
    %c0_4 = arith.constant 0 : index
    %c0_5 = arith.constant 0 : index
    %c0_6 = arith.constant 0 : index
    %8 = vector.load %arg4[%7, %c0_4, %c0_5, %c0_6] : memref<4x2x4x32xf32, #tpu.memory_space<vmem>>, vector<1x1x4x32xf32>
    %9 = vector.shape_cast %8 : vector<1x1x4x32xf32> to vector<4x32xf32>
    %10 = arith.index_cast %c0_i32 : i32 to index
    %c1_7 = arith.constant 1 : index
    %c0_8 = arith.constant 0 : index
    %c0_9 = arith.constant 0 : index
    %11 = vector.load %arg4[%10, %c1_7, %c0_8, %c0_9] : memref<4x2x4x32xf32, #tpu.memory_space<vmem>>, vector<1x1x4x32xf32>
    %12 = vector.shape_cast %11 : vector<1x1x4x32xf32> to vector<4x32xf32>
    %13 = arith.addf %9, %12 : vector<4x32xf32>
    %14 = vector.shape_cast %13 : vector<4x32xf32> to vector<1x4x32xf32>
    %15 = arith.subf %12, %9 : vector<4x32xf32>
    %16 = vector.shape_cast %15 : vector<4x32xf32> to vector<1x4x32xf32>
    %17 = arith.addf %3, %6 : vector<2x32xf32>
    %18 = vector.shape_cast %17 : vector<2x32xf32> to vector<2x1x32xf32>
    %19 = vector.shape_cast %9 : vector<4x32xf32> to vector<1x4x32xf32>
    %20 = vector.broadcast %18 : vector<2x1x32xf32> to vector<2x4x32xf32>
    %21 = vector.broadcast %19 : vector<1x4x32xf32> to vector<2x4x32xf32>
    %22 = arith.mulf %20, %21 : vector<2x4x32xf32>
    %23 = vector.shape_cast %6 : vector<2x32xf32> to vector<2x1x32xf32>
    %24 = vector.broadcast %23 : vector<2x1x32xf32> to vector<2x4x32xf32>
    %25 = vector.broadcast %14 : vector<1x4x32xf32> to vector<2x4x32xf32>
    %26 = arith.mulf %24, %25 : vector<2x4x32xf32>
    %27 = arith.subf %22, %26 : vector<2x4x32xf32>
    %28 = arith.addf %0, %27 : vector<2x4x32xf32>
    %29 = vector.shape_cast %3 : vector<2x32xf32> to vector<2x1x32xf32>
    %30 = vector.broadcast %29 : vector<2x1x32xf32> to vector<2x4x32xf32>
    %31 = vector.broadcast %16 : vector<1x4x32xf32> to vector<2x4x32xf32>
    %32 = arith.mulf %30, %31 : vector<2x4x32xf32>
    %33 = arith.addf %22, %32 : vector<2x4x32xf32>
    %34 = arith.addf %0, %33 : vector<2x4x32xf32>
    %c1_i32 = arith.constant 1 : i32
    %35 = arith.index_cast %c1_i32 : i32 to index
    %c0_10 = arith.constant 0 : index
    %c0_11 = arith.constant 0 : index
    %c0_12 = arith.constant 0 : index
    %36 = vector.load %arg3[%35, %c0_10, %c0_11, %c0_12] : memref<4x2x2x32xf32, #tpu.memory_space<vmem>>, vector<1x1x2x32xf32>
    %37 = vector.shape_cast %36 : vector<1x1x2x32xf32> to vector<2x32xf32>
    %38 = arith.index_cast %c1_i32 : i32 to index
    %c1_13 = arith.constant 1 : index
    %c0_14 = arith.constant 0 : index
    %c0_15 = arith.constant 0 : index
    %39 = vector.load %arg3[%38, %c1_13, %c0_14, %c0_15] : memref<4x2x2x32xf32, #tpu.memory_space<vmem>>, vector<1x1x2x32xf32>
    %40 = vector.shape_cast %39 : vector<1x1x2x32xf32> to vector<2x32xf32>
    %41 = arith.index_cast %c1_i32 : i32 to index
    %c0_16 = arith.constant 0 : index
    %c0_17 = arith.constant 0 : index
    %c0_18 = arith.constant 0 : index
    %42 = vector.load %arg4[%41, %c0_16, %c0_17, %c0_18] : memref<4x2x4x32xf32, #tpu.memory_space<vmem>>, vector<1x1x4x32xf32>
    %43 = vector.shape_cast %42 : vector<1x1x4x32xf32> to vector<4x32xf32>
    %44 = arith.index_cast %c1_i32 : i32 to index
    %c1_19 = arith.constant 1 : index
    %c0_20 = arith.constant 0 : index
    %c0_21 = arith.constant 0 : index
    %45 = vector.load %arg4[%44, %c1_19, %c0_20, %c0_21] : memref<4x2x4x32xf32, #tpu.memory_space<vmem>>, vector<1x1x4x32xf32>
    %46 = vector.shape_cast %45 : vector<1x1x4x32xf32> to vector<4x32xf32>
    %47 = arith.addf %43, %46 : vector<4x32xf32>
    %48 = vector.shape_cast %47 : vector<4x32xf32> to vector<1x4x32xf32>
    %49 = arith.subf %46, %43 : vector<4x32xf32>
    %50 = vector.shape_cast %49 : vector<4x32xf32> to vector<1x4x32xf32>
    %51 = arith.addf %37, %40 : vector<2x32xf32>
    %52 = vector.shape_cast %51 : vector<2x32xf32> to vector<2x1x32xf32>
    %53 = vector.shape_cast %43 : vector<4x32xf32> to vector<1x4x32xf32>
    %54 = vector.broadcast %52 : vector<2x1x32xf32> to vector<2x4x32xf32>
    %55 = vector.broadcast %53 : vector<1x4x32xf32> to vector<2x4x32xf32>
    %56 = arith.mulf %54, %55 : vector<2x4x32xf32>
    %57 = vector.shape_cast %40 : vector<2x32xf32> to vector<2x1x32xf32>
    %58 = vector.broadcast %57 : vector<2x1x32xf32> to vector<2x4x32xf32>
    %59 = vector.broadcast %48 : vector<1x4x32xf32> to vector<2x4x32xf32>
    %60 = arith.mulf %58, %59 : vector<2x4x32xf32>
    %61 = arith.subf %56, %60 : vector<2x4x32xf32>
    %62 = arith.addf %28, %61 : vector<2x4x32xf32>
    %63 = vector.shape_cast %37 : vector<2x32xf32> to vector<2x1x32xf32>
    %64 = vector.broadcast %63 : vector<2x1x32xf32> to vector<2x4x32xf32>
    %65 = vector.broadcast %50 : vector<1x4x32xf32> to vector<2x4x32xf32>
    %66 = arith.mulf %64, %65 : vector<2x4x32xf32>
    %67 = arith.addf %56, %66 : vector<2x4x32xf32>
    %68 = arith.addf %34, %67 : vector<2x4x32xf32>
    %c2_i32 = arith.constant 2 : i32
    %69 = arith.index_cast %c2_i32 : i32 to index
    %c0_22 = arith.constant 0 : index
    %c0_23 = arith.constant 0 : index
    %c0_24 = arith.constant 0 : index
    %70 = vector.load %arg3[%69, %c0_22, %c0_23, %c0_24] : memref<4x2x2x32xf32, #tpu.memory_space<vmem>>, vector<1x1x2x32xf32>
    %71 = vector.shape_cast %70 : vector<1x1x2x32xf32> to vector<2x32xf32>
    %72 = arith.index_cast %c2_i32 : i32 to index
    %c1_25 = arith.constant 1 : index
    %c0_26 = arith.constant 0 : index
    %c0_27 = arith.constant 0 : index
    %73 = vector.load %arg3[%72, %c1_25, %c0_26, %c0_27] : memref<4x2x2x32xf32, #tpu.memory_space<vmem>>, vector<1x1x2x32xf32>
    %74 = vector.shape_cast %73 : vector<1x1x2x32xf32> to vector<2x32xf32>
    %75 = arith.index_cast %c2_i32 : i32 to index
    %c0_28 = arith.constant 0 : index
    %c0_29 = arith.constant 0 : index
    %c0_30 = arith.constant 0 : index
    %76 = vector.load %arg4[%75, %c0_28, %c0_29, %c0_30] : memref<4x2x4x32xf32, #tpu.memory_space<vmem>>, vector<1x1x4x32xf32>
    %77 = vector.shape_cast %76 : vector<1x1x4x32xf32> to vector<4x32xf32>
    %78 = arith.index_cast %c2_i32 : i32 to index
    %c1_31 = arith.constant 1 : index
    %c0_32 = arith.constant 0 : index
    %c0_33 = arith.constant 0 : index
    %79 = vector.load %arg4[%78, %c1_31, %c0_32, %c0_33] : memref<4x2x4x32xf32, #tpu.memory_space<vmem>>, vector<1x1x4x32xf32>
    %80 = vector.shape_cast %79 : vector<1x1x4x32xf32> to vector<4x32xf32>
    %81 = arith.addf %77, %80 : vector<4x32xf32>
    %82 = vector.shape_cast %81 : vector<4x32xf32> to vector<1x4x32xf32>
    %83 = arith.subf %80, %77 : vector<4x32xf32>
    %84 = vector.shape_cast %83 : vector<4x32xf32> to vector<1x4x32xf32>
    %85 = arith.addf %71, %74 : vector<2x32xf32>
    %86 = vector.shape_cast %85 : vector<2x32xf32> to vector<2x1x32xf32>
    %87 = vector.shape_cast %77 : vector<4x32xf32> to vector<1x4x32xf32>
    %88 = vector.broadcast %86 : vector<2x1x32xf32> to vector<2x4x32xf32>
    %89 = vector.broadcast %87 : vector<1x4x32xf32> to vector<2x4x32xf32>
    %90 = arith.mulf %88, %89 : vector<2x4x32xf32>
    %91 = vector.shape_cast %74 : vector<2x32xf32> to vector<2x1x32xf32>
    %92 = vector.broadcast %91 : vector<2x1x32xf32> to vector<2x4x32xf32>
    %93 = vector.broadcast %82 : vector<1x4x32xf32> to vector<2x4x32xf32>
    %94 = arith.mulf %92, %93 : vector<2x4x32xf32>
    %95 = arith.subf %90, %94 : vector<2x4x32xf32>
    %96 = arith.addf %62, %95 : vector<2x4x32xf32>
    %97 = vector.shape_cast %71 : vector<2x32xf32> to vector<2x1x32xf32>
    %98 = vector.broadcast %97 : vector<2x1x32xf32> to vector<2x4x32xf32>
    %99 = vector.broadcast %84 : vector<1x4x32xf32> to vector<2x4x32xf32>
    %100 = arith.mulf %98, %99 : vector<2x4x32xf32>
    %101 = arith.addf %90, %100 : vector<2x4x32xf32>
    %102 = arith.addf %68, %101 : vector<2x4x32xf32>
    %c3_i32 = arith.constant 3 : i32
    %103 = arith.index_cast %c3_i32 : i32 to index
    %c0_34 = arith.constant 0 : index
    %c0_35 = arith.constant 0 : index
    %c0_36 = arith.constant 0 : index
    %104 = vector.load %arg3[%103, %c0_34, %c0_35, %c0_36] : memref<4x2x2x32xf32, #tpu.memory_space<vmem>>, vector<1x1x2x32xf32>
    %105 = vector.shape_cast %104 : vector<1x1x2x32xf32> to vector<2x32xf32>
    %106 = arith.index_cast %c3_i32 : i32 to index
    %c1_37 = arith.constant 1 : index
    %c0_38 = arith.constant 0 : index
    %c0_39 = arith.constant 0 : index
    %107 = vector.load %arg3[%106, %c1_37, %c0_38, %c0_39] : memref<4x2x2x32xf32, #tpu.memory_space<vmem>>, vector<1x1x2x32xf32>
    %108 = vector.shape_cast %107 : vector<1x1x2x32xf32> to vector<2x32xf32>
    %109 = arith.index_cast %c3_i32 : i32 to index
    %c0_40 = arith.constant 0 : index
    %c0_41 = arith.constant 0 : index
    %c0_42 = arith.constant 0 : index
    %110 = vector.load %arg4[%109, %c0_40, %c0_41, %c0_42] : memref<4x2x4x32xf32, #tpu.memory_space<vmem>>, vector<1x1x4x32xf32>
    %111 = vector.shape_cast %110 : vector<1x1x4x32xf32> to vector<4x32xf32>
    %112 = arith.index_cast %c3_i32 : i32 to index
    %c1_43 = arith.constant 1 : index
    %c0_44 = arith.constant 0 : index
    %c0_45 = arith.constant 0 : index
    %113 = vector.load %arg4[%112, %c1_43, %c0_44, %c0_45] : memref<4x2x4x32xf32, #tpu.memory_space<vmem>>, vector<1x1x4x32xf32>
    %114 = vector.shape_cast %113 : vector<1x1x4x32xf32> to vector<4x32xf32>
    %115 = arith.addf %111, %114 : vector<4x32xf32>
    %116 = vector.shape_cast %115 : vector<4x32xf32> to vector<1x4x32xf32>
    %117 = arith.subf %114, %111 : vector<4x32xf32>
    %118 = vector.shape_cast %117 : vector<4x32xf32> to vector<1x4x32xf32>
    %119 = arith.addf %105, %108 : vector<2x32xf32>
    %120 = vector.shape_cast %119 : vector<2x32xf32> to vector<2x1x32xf32>
    %121 = vector.shape_cast %111 : vector<4x32xf32> to vector<1x4x32xf32>
    %122 = vector.broadcast %120 : vector<2x1x32xf32> to vector<2x4x32xf32>
    %123 = vector.broadcast %121 : vector<1x4x32xf32> to vector<2x4x32xf32>
    %124 = arith.mulf %122, %123 : vector<2x4x32xf32>
    %125 = vector.shape_cast %108 : vector<2x32xf32> to vector<2x1x32xf32>
    %126 = vector.broadcast %125 : vector<2x1x32xf32> to vector<2x4x32xf32>
    %127 = vector.broadcast %116 : vector<1x4x32xf32> to vector<2x4x32xf32>
    %128 = arith.mulf %126, %127 : vector<2x4x32xf32>
    %129 = arith.subf %124, %128 : vector<2x4x32xf32>
    %130 = arith.addf %96, %129 : vector<2x4x32xf32>
    %131 = vector.shape_cast %105 : vector<2x32xf32> to vector<2x1x32xf32>
    %132 = vector.broadcast %131 : vector<2x1x32xf32> to vector<2x4x32xf32>
    %133 = vector.broadcast %118 : vector<1x4x32xf32> to vector<2x4x32xf32>
    %134 = arith.mulf %132, %133 : vector<2x4x32xf32>
    %135 = arith.addf %124, %134 : vector<2x4x32xf32>
    %136 = arith.addf %102, %135 : vector<2x4x32xf32>
    %c4_i32 = arith.constant 4 : i32
    %c0_46 = arith.constant 0 : index
    %c0_47 = arith.constant 0 : index
    %c0_48 = arith.constant 0 : index
    %c0_49 = arith.constant 0 : index
    %137 = vector.load %arg5[%c0_46, %c0_47, %c0_48, %c0_49] : memref<2x2x4x32xf32, #tpu.memory_space<vmem>>, vector<1x2x4x32xf32>
    %138 = vector.shape_cast %137 : vector<1x2x4x32xf32> to vector<2x4x32xf32>
    %139 = vector.shape_cast %130 : vector<2x4x32xf32> to vector<1x2x4x32xf32>
    tpu.vector_store %arg5[%c0_46, %c0_47, %c0_48, %c0_49], %139 {strides = array<i32>} : memref<2x2x4x32xf32, #tpu.memory_space<vmem>>, vector<1x2x4x32xf32>,
    %c1_50 = arith.constant 1 : index
    %c0_51 = arith.constant 0 : index
    %c0_52 = arith.constant 0 : index
    %c0_53 = arith.constant 0 : index
    %140 = vector.load %arg5[%c1_50, %c0_51, %c0_52, %c0_53] : memref<2x2x4x32xf32, #tpu.memory_space<vmem>>, vector<1x2x4x32xf32>
    %141 = vector.shape_cast %140 : vector<1x2x4x32xf32> to vector<2x4x32xf32>
    %142 = vector.shape_cast %136 : vector<2x4x32xf32> to vector<1x2x4x32xf32>
    tpu.vector_store %arg5[%c1_50, %c0_51, %c0_52, %c0_53], %142 {strides = array<i32>} : memref<2x2x4x32xf32, #tpu.memory_space<vmem>>, vector<1x2x4x32xf32>,
    return
  }
  func.func @transform_0(%arg0: i32, %arg1: i32, %arg2: i32) -> (i32, i32, i32, i32) {
    %c0_i32 = arith.constant 0 : i32
    %c0_i32_0 = arith.constant 0 : i32
    %c0_i32_1 = arith.constant 0 : i32
    return %c0_i32, %c0_i32_0, %arg2, %arg0 : i32, i32, i32, i32
  }
  func.func @transform_1(%arg0: i32, %arg1: i32, %arg2: i32) -> (i32, i32, i32, i32) {
    %c0_i32 = arith.constant 0 : i32
    %c0_i32_0 = arith.constant 0 : i32
    %c0_i32_1 = arith.constant 0 : i32
    return %c0_i32, %c0_i32_0, %arg1, %arg0 : i32, i32, i32, i32
  }
  func.func @transform_2(%arg0: i32, %arg1: i32, %arg2: i32) -> (i32, i32, i32, i32) {
    %c0_i32 = arith.constant 0 : i32
    %c0_i32_0 = arith.constant 0 : i32
    return %c0_i32, %arg2, %arg1, %arg0 : i32, i32, i32, i32
  }
}

</mosaic_0001>

<bundles_post_ra>
// kernel: tpu_custom_call.1
= control target key start
LH: loop header
LB: loop body
LE: loop exit
PB: predicated region body
PF: predicated region fallthrough
CT: control target
= control target key end

     0   :  { %7 = vsyncpa [#allocation3], 0  ;;  %s860_s0 = inlined_call_operand.hbm [shape: f32[4,2,2,32], index: 0, kind: input, shape index: {}]   ;;  %s861_s1 = inlined_call_operand.hbm [shape: f32[4,2,4,32], index: 1, kind: input, shape index: {}]   ;;  %s862_s2 = inlined_call_operand.hbm [shape: f32[2,2,4,32], index: 2, kind: output, shape index: {}]  }
   0x1   :  { %8 = vsyncpa [#allocation6], 0 }
   0x2   :  { %9 = vsyncpa [#allocation4], 0  ;;  %s638_s9 = smov [#allocation2]   ;;  %s566_s13 = scalar_lea.hbm %s860_s0, 256 }
   0x3   :  { %s15_s10 = sshll.u32 %s638_s9, 4  ;;  %p567_p0 = scmp.ne.s32.totalorder %s860_s0, %s566_s13  ;;  %s16_s10 = int_to_ptr.vmem [resolvable:$true] %s15_s10 }
   0x4   :  { %p570_p1 = scmp.lt.u32.totalorder %s566_s13, %s860_s0 }
   0x6   :  { %p572_p2 = pnand %p570_p1, %p567_p0 }
   0x8   :  { %575 = shalt.err (!%p572_p2)
}
   0x9   :  { %s576_s18 = scalar_lea.vmem %s16_s10, 256  ;;  %p581_p4 = scmp.lt.s32.totalorder %s16_s10, %s16_s10 }
   0xa   :  { %p577_p3 = scmp.ne.s32.totalorder %s16_s10, %s576_s18  ;;  %p582_p5 = scmp.lt.s32.totalorder %s576_s18, %s576_s18 }
   0xc   :  { %p583_p6 = por %p582_p5, %p581_p4 }
   0xe   :  { %p584_p7 = pnand %p583_p6, %p577_p3 }
  0x10   :  { %587 = shalt.err (!%p584_p7)
}
  0x11   :  { %s639_s19 = smov 32   ;;  %s640_s20 = smov 2  }
  0x12   :  { %21 = dma.hbm_to_vmem [thread:$0]  %s860_s0, 256, %s16_s10, [#allocation3], %s639_s19, %s639_s19, %s640_s20  }
  0x13   :  { %s641_s23 = smov [#allocation5]   ;;  %s588_s27 = scalar_lea.hbm %s861_s1, 512 }
  0x14   :  { %s27_s24 = sshll.u32 %s641_s23, 4  ;;  %p589_p8 = scmp.ne.s32.totalorder %s861_s1, %s588_s27  ;;  %s28_s24 = int_to_ptr.vmem [resolvable:$true] %s27_s24 }
  0x15   :  { %p592_p9 = scmp.lt.u32.totalorder %s588_s27, %s861_s1 }
  0x17   :  { %p594_p10 = pnand %p592_p9, %p589_p8 }
  0x19   :  { %597 = shalt.err (!%p594_p10)
}
  0x1a   :  { %s598_s4 = scalar_lea.vmem %s28_s24, 512  ;;  %p603_p12 = scmp.lt.s32.totalorder %s28_s24, %s28_s24 }
  0x1b   :  { %p599_p11 = scmp.ne.s32.totalorder %s28_s24, %s598_s4  ;;  %p604_p13 = scmp.lt.s32.totalorder %s598_s4, %s598_s4 }
  0x1d   :  { %p605_p0 = por %p604_p13, %p603_p12 }
  0x1f   :  { %p606_p1 = pnand %p605_p0, %p599_p11 }
  0x21   :  { %609 = shalt.err (!%p606_p1)
}
  0x22   :  { %s642_s0 = smov 64   ;;  %s643_s5 = smov 4  }
  0x23   :  { %33 = dma.hbm_to_vmem [thread:$0]  %s861_s1, 512, %s28_s24, [#allocation6], %s642_s0, %s642_s0, %s643_s5  }
  0x24   :  { %632 = dma.done.wait [#allocation3], 256  }
  0x25   :  { %633 = vsyncadd [#allocation3], 4294967040 }
  0x26   :  { %634 = dma.done.wait [#allocation6], 512  }
  0x27   :  { %635 = vsyncadd [#allocation6], 4294966784  ;;  %v53_v0 = vlaneseq  ;;  %v644_v1 = vmov 1966171168   ;;  %v40_v7 = vld [vmem:[#allocation2] sm:$0x3] }
  0x28   :  { %v51_v2 = vunpack.c.l.s4 %v644_v1  ;;  %v42_v8 = vld [vmem:[#allocation2 + $0x2] sm:$0x3]  ;;  %v692_v9 = vld [vmem:[#allocation5] sm:$0xf]  ;;  %v45_v10 = vld [vmem:[#allocation5 + $0x4] sm:$0xf] }
  0x29   :  { %v54_v3 = vshrl.u32 %v53_v0, 7  ;;  %v48_v11 = vadd.f32 %v42_v8, %v40_v7  ;;  %v695_v13 = vld [vmem:[#allocation2 + $0x4] sm:$0x3]  ;;  %v165_v14 = vld [vmem:[#allocation2 + $0x6] sm:$0x3]  ;;  %v46_v16 = vadd.f32 %v45_v10, %v692_v9  ;;  %v710_v22 = vsub.f32 %v45_v10, %v692_v9  ;;  %s645_s1 = smov [#allocation7]  }
  0x2a   :  { %v52_v4 = vunpack.c.0.s8 %v51_v2  ;;  %v701_v17 = vld [vmem:[#allocation5 + $0x8] sm:$0xf]  ;;  %v703_v18 = vld [vmem:[#allocation5 + $0xc] sm:$0xf]  ;;  %v172_v19 = vadd.f32 %v165_v14, %v695_v13  ;;  %v707_v21 = vld [vmem:[#allocation2 + $0x8] sm:$0x3] }
  0x2b   :  { %v690_v6 = vsub.s32 0, %v54_v3  ;;  %v716_v25 = vadd.f32 %v703_v18, %v701_v17  ;;  %v289_v26 = vld [vmem:[#allocation2 + $0xa] sm:$0x3]  ;;  %v718_v27 = vld [vmem:[#allocation5 + $0x10] sm:$0xf]  ;;  %vm534_vm0 = vcmask 257024  }
  0x2c   :  { %v688_v5 = vsub.s32 %v52_v4, %v54_v3  ;;  %v720_v28 = vld [vmem:[#allocation5 + $0x14] sm:$0xf]  ;;  %v296_v33 = vadd.f32 %v289_v26, %v707_v21  ;;  %v729_v34 = vld [vmem:[#allocation2 + $0xc] sm:$0x3]  ;;  %v413_v35 = vld [vmem:[#allocation2 + $0xe] sm:$0x3] }
  0x2d   :  { %v726_v32 = vadd.f32 %v720_v28, %v718_v27  ;;  %v731_v36 = vld [vmem:[#allocation5 + $0x18] sm:$0xf]  ;;  %v736_v40 = vld [vmem:[#allocation5 + $0x1c] sm:$0xf]  ;;  %v420_v41 = vadd.f32 %v413_v35, %v729_v34  ;;  %s545_s8 = sshll.u32 %s645_s1, 4  ;;  %s546_s8 = int_to_ptr.vmem [resolvable:$true] %s545_s8 }
  0x2e   :  { %v91_v12 = vrot.slane %v42_v8, %v688_v5  ;;  %v698_v15 = vrot.slane %v40_v7, %v688_v5  ;;  %v215_v20 = vrot.slane %v165_v14, %v688_v5  ;;  %v56_v23 = vrot.slane %v48_v11, %v688_v5  ;;  %s610_s9 = scalar_lea.vmem %s546_s8, 256  ;;  %p615_p3 = scmp.lt.s32.totalorder %s546_s8, %s546_s8 }
  0x2f   :  { %v180_v30 = vrot.slane %v172_v19, %v688_v5  ;;  %v339_v39 = vrot.slane %v289_v26, %v688_v5  ;;  %v304_v44 = vrot.slane %v296_v33, %v688_v5  ;;  %v744_v45 = vadd.f32 %v736_v40, %v731_v36  ;;  %p611_p2 = scmp.ne.s32.totalorder %s546_s8, %s610_s9  ;;  %p616_p4 = scmp.lt.s32.totalorder %s610_s9, %s610_s9 }
  0x30   :  { %v99_v24 = vrot.slane %v91_v12, %v688_v5  ;;  %v92_v29 = vcombine.high %v91_v12, %v91_v12  ;;  %v223_v31 = vrot.slane %v215_v20, %v688_v5  ;;  %v64_v37 = vrot.slane %v56_v23, %v688_v5 }
  0x31   :  { %v188_v42 = vrot.slane %v180_v30, %v688_v5  ;;  %v347_v48 = vrot.slane %v339_v39, %v688_v5  ;;  %v428_v49 = vrot.slane %v420_v41, %v688_v5  ;;  %v312_v52 = vrot.slane %v304_v44, %v688_v5  ;;  %p617_p5 = por %p616_p4, %p615_p3 }
  0x32   :  { %v110_v38 = vrot.slane %v99_v24, %v690_v6  ;;  %v234_v43 = vrot.slane %v223_v31, %v690_v6  ;;  %v75_v46 = vrot.slane %v64_v37, %v690_v6  ;;  %v463_v53 = vrot.slane %v413_v35, %v688_v5 }
  0x33   :  { %v199_v50 = vrot.slane %v188_v42, %v690_v6  ;;  %v358_v55 = vrot.slane %v347_v48, %v690_v6  ;;  %v436_v56 = vrot.slane %v428_v49, %v688_v5  ;;  %v57_v57 = vcombine.high %v56_v23, %v56_v23  ;;  %p618_p6 = pnand %p617_p5, %p611_p2 }
  0x34   :  { %v117_v47 = vmul.f32 %v110_v38, %v46_v16  ;;  %v241_v51 = vmul.f32 %v234_v43, %v716_v25  ;;  %v754_v54 = vmul.f32 %v75_v46, %v692_v9  ;;  %v323_v59 = vrot.slane %v312_v52, %v690_v6 }
  0x35   :  { %v759_v58 = vmul.f32 %v199_v50, %v701_v17  ;;  %v471_v60 = vrot.slane %v463_v53, %v688_v5  ;;  %v106_v61 = vrot.slane %v92_v29, %v688_v5  ;;  %v365_v63 = vmul.f32 %v358_v55, %v726_v32 }
  0x36   :  { %v119_v62 = vsub.f32 %v754_v54, %v117_v47  ;;  %v447_v0 = vrot.slane %v436_v56, %v690_v6  ;;  %v71_v1 = vrot.slane %v57_v57, %v688_v5  ;;  %v770_v3 = vmul.f32 %v323_v59, %v718_v27 }
  0x37   :  { %v243_v2 = vsub.f32 %v759_v58, %v241_v51  ;;  %v482_v4 = vrot.slane %v471_v60, %v690_v6  ;;  %v114_v7 = vrot.slane %v106_v61, %v690_v6  ;;  %v181_v11 = vcombine.high %v180_v30, %v180_v30 }
  0x38   :  { %v775_v8 = vmul.f32 %v447_v0, %v731_v36  ;;  %v79_v10 = vrot.slane %v71_v1, %v690_v6  ;;  %v216_v12 = vcombine.high %v215_v20, %v215_v20  ;;  %v367_v19 = vsub.f32 %v770_v3, %v365_v63 }
  0x39   :  { %v245_v14 = vadd.f32 %v243_v2, %v119_v62  ;;  %v489_v23 = vmul.f32 %v482_v4, %v744_v45  ;;  %v118_v24 = vmul.f32 %v114_v7, %v46_v16  ;;  %v195_v29 = vrot.slane %v181_v11, %v688_v5 }
  0x3a   :  { %v781_v26 = vmul.f32 %v79_v10, %v692_v9  ;;  %v230_v31 = vrot.slane %v216_v12, %v688_v5  ;;  %v305_v33 = vcombine.high %v304_v44, %v304_v44  ;;  %v340_v38 = vcombine.high %v339_v39, %v339_v39 }
  0x3b   :  { %v369_v35 = vadd.f32 %v367_v19, %v245_v14  ;;  %v491_v37 = vsub.f32 %v775_v8, %v489_v23  ;;  %v429_v30 = vcombine.high %v428_v49, %v428_v49  ;;  %v203_v41 = vrot.slane %v195_v29, %v690_v6 }
  0x3c   :  { %v120_v20 = vsub.f32 %v781_v26, %v118_v24  ;;  %v238_v42 = vrot.slane %v230_v31, %v690_v6  ;;  %v319_v16 = vrot.slane %v305_v33, %v688_v5  ;;  %v354_v43 = vrot.slane %v340_v38, %v688_v5 }
  0x3d   :  { %v493_v9 = vadd.f32 %v491_v37, %v369_v35  ;;  %v443_v46 = vrot.slane %v429_v30, %v688_v5  ;;  %v464_v47 = vcombine.high %v463_v53, %v463_v53  ;;  %v207_v44 = vmul.f32 %v203_v41, %v701_v17 }
  0x3e   :  { %v242_v48 = vmul.f32 %v238_v42, %v716_v25  ;;  %v327_v39 = vrot.slane %v319_v16, %v690_v6  ;;  %v138_v49 = vrot.slane %v698_v15, %v688_v5  ;;  %v362_v50 = vrot.slane %v354_v43, %v690_v6 }
  0x3f   :  { %535 = vst.msk [vmem:[#allocation7] sm:$0xf] %vm534_vm0, %v493_v9  ;;  %v451_v51 = vrot.slane %v443_v46, %v690_v6  ;;  %v478_v52 = vrot.slane %v464_v47, %v688_v5  ;;  %v171_v53 = vsub.f32 %v703_v18, %v701_v17  ;;  %v254_v57 = vrot.slane %v695_v13, %v688_v5 }
  0x40   :  { %v244_v55 = vsub.f32 %v207_v44, %v242_v48  ;;  %v331_v56 = vmul.f32 %v327_v39, %v718_v27  ;;  %v149_v25 = vrot.slane %v138_v49, %v690_v6  ;;  %v366_v59 = vmul.f32 %v362_v50, %v726_v32 }
  0x41   :  { %v455_v60 = vmul.f32 %v451_v51, %v731_v36  ;;  %v486_v61 = vrot.slane %v478_v52, %v690_v6  ;;  %v295_v62 = vsub.f32 %v720_v28, %v718_v27  ;;  %v262_v18 = vrot.slane %v254_v57, %v688_v5 }
  0x42   :  { %v246_v63 = vadd.f32 %v244_v55, %v120_v20  ;;  %v156_v17 = vmul.f32 %v149_v25, %v710_v22  ;;  %v378_v0 = vrot.slane %v707_v21, %v688_v5  ;;  %v368_v1 = vsub.f32 %v331_v56, %v366_v59 }
  0x43   :  { %v490_v13 = vmul.f32 %v486_v61, %v744_v45  ;;  %v419_v32 = vsub.f32 %v736_v40, %v731_v36  ;;  %v502_v2 = vrot.slane %v729_v34, %v688_v5  ;;  %v273_v27 = vrot.slane %v262_v18, %v690_v6 }
  0x44   :  { %v158_v4 = vadd.f32 %v156_v17, %v754_v54  ;;  %v386_v28 = vrot.slane %v378_v0, %v688_v5  ;;  %v131_v7 = vcombine.high %v698_v15, %v698_v15  ;;  %v370_v10 = vadd.f32 %v368_v1, %v246_v63 }
  0x45   :  { %v492_v21 = vsub.f32 %v455_v60, %v490_v13  ;;  %v510_v11 = vrot.slane %v502_v2, %v688_v5  ;;  %v255_v45 = vcombine.high %v254_v57, %v254_v57  ;;  %v280_v12 = vmul.f32 %v273_v27, %v171_v53 }
  0x46   :  { %v397_v36 = vrot.slane %v386_v28, %v690_v6  ;;  %v145_v40 = vrot.slane %v131_v7, %v688_v5  ;;  %v379_v34 = vcombine.high %v378_v0, %v378_v0  ;;  %v503_v23 = vcombine.high %v502_v2, %v502_v2 }
  0x47   :  { %v494_v14 = vadd.f32 %v492_v21, %v370_v10  ;;  %v521_v54 = vrot.slane %v510_v11, %v690_v6  ;;  %v269_v19 = vrot.slane %v255_v45, %v688_v5  ;;  %v282_v24 = vadd.f32 %v280_v12, %v759_v58 }
  0x48   :  { %v404_v15 = vmul.f32 %v397_v36, %v295_v62  ;;  %v153_v29 = vrot.slane %v145_v40, %v690_v6  ;;  %v393_v31 = vrot.slane %v379_v34, %v688_v5  ;;  %v517_v37 = vrot.slane %v503_v23, %v688_v5 }
  0x49   :  { %536 = vst.msk [vmem:[#allocation7 + $0x4] sm:$0xf] %vm534_vm0, %v494_v14  ;;  %v528_v33 = vmul.f32 %v521_v54, %v419_v32  ;;  %v277_v35 = vrot.slane %v269_v19, %v690_v6  ;;  %v284_v38 = vadd.f32 %v282_v24, %v158_v4 }
  0x4a   :  { %v406_v30 = vadd.f32 %v404_v15, %v770_v3  ;;  %v157_v20 = vmul.f32 %v153_v29, %v710_v22  ;;  %v401_v41 = vrot.slane %v393_v31, %v690_v6  ;;  %v525_v16 = vrot.slane %v517_v37, %v690_v6 }
  0x4b   :  { %v530_v58 = vadd.f32 %v528_v33, %v775_v8  ;;  %v281_v42 = vmul.f32 %v277_v35, %v171_v53 }
  0x4c   :  { %v408_v9 = vadd.f32 %v406_v30, %v284_v38  ;;  %v159_v43 = vadd.f32 %v157_v20, %v781_v26  ;;  %v405_v46 = vmul.f32 %v401_v41, %v295_v62  ;;  %v529_v48 = vmul.f32 %v525_v16, %v419_v32 }
  0x4d   :  { %v283_v47 = vadd.f32 %v281_v42, %v207_v44 }
  0x4e   :  { %v532_v39 = vadd.f32 %v530_v58, %v408_v9  ;;  %v407_v5 = vadd.f32 %v405_v46, %v331_v56  ;;  %v531_v50 = vadd.f32 %v529_v48, %v455_v60 }
  0x4f   :  { %v285_v49 = vadd.f32 %v283_v47, %v159_v43 }
  0x50   :  { %538 = vst.msk [vmem:[#allocation7 + $0x8] sm:$0xf] %vm534_vm0, %v532_v39 }
  0x51   :  { %v409_v22 = vadd.f32 %v407_v5, %v285_v49 }
  0x53   :  { %v533_v3 = vadd.f32 %v531_v50, %v409_v22 }
  0x55   :  { %539 = vst.msk [vmem:[#allocation7 + $0xc] sm:$0xf] %vm534_vm0, %v533_v3 }
  0x56   :  { %621 = shalt.err (!%p618_p6)
}
  0x57   :  { %s622_s12 = scalar_lea.hbm %s862_s2, 256 }
  0x58   :  { %p623_p7 = scmp.ne.s32.totalorder %s862_s2, %s622_s12  ;;  %p626_p8 = scmp.lt.u32.totalorder %s622_s12, %s862_s2 }
  0x5a   :  { %p628_p9 = pnand %p626_p8, %p623_p7 }
  0x5c   :  { %631 = shalt.err (!%p628_p9)
}
  0x5d   :  { %551 = dma.vmem_to_hbm [thread:$0]  %s546_s8, 256, %s862_s2, [#allocation4], %s642_s0, %s642_s0, %s643_s5  }
  0x5e   :  { %636 = dma.done.wait [#allocation4], 256  }
  0x5f   :  { %637 = vsyncadd [#allocation4], 4294967040 }
  0x60   :  { %555 = vsyncpa [#allocation3], 1 }
  0x61   :  { %556 = vsyncpa [#allocation6], 1 }
  0x62   :  { %557 = vsyncpa [#allocation4], 1 }

</bundles_post_ra>
